<compile_context>
chip_gen: v7x
topology: tpu7x:2x2x1
jax: 0.10.0
libtpu: 0.0.40
codegen_flags: <defaults>
</compile_context>

<pallas_src>
import functools

import numpy as np

import jax
import jax.numpy as jnp
from jax.experimental import pallas as pl
from jax.experimental.pallas import tpu as pltpu


def _build_tap_masks(H, W):
    """(9, H*W) float32 validity masks for the 9 conv taps (1 inside, 0 halo)."""
    rows = np.repeat(np.arange(H), W)          # (HW,) row index of each pixel
    cols = np.tile(np.arange(W), H)            # (HW,) col index of each pixel
    masks = np.zeros((9, H * W), np.float32)
    for kh in range(3):
        for kw in range(3):
            di, dj = kh - 1, kw - 1
            valid = ((rows + di >= 0) & (rows + di < H) &
                     (cols + dj >= 0) & (cols + dj < W))
            masks[kh * 3 + kw] = valid.astype(np.float32)
    return masks


def spatial_attention_kernel(w_ref, mask_ref, x_ref, o_ref, *, H, W):
    # w_ref    : (18,) f32, SMEM     conv3x3 weight, flat layout [cin(2), kh(3), kw(3)]
    # mask_ref : (9, 1, H*W) f32     per-tap halo masks (constant across grid)
    # x_ref    : (1, C, H*W) f32     one image, spatial flattened (lane-dense)
    # o_ref    : (1, 1, H*W) f32
    C = x_ref.shape[1]
    HW = H * W

    x = x_ref[0].astype(jnp.float32)                         # (C, HW)
    x_max = jnp.max(x, axis=0, keepdims=True)                # (1, HW) channel max
    x_mean = jnp.sum(x, axis=0, keepdims=True) * (1.0 / C)   # (1, HW) channel mean

    acc = jnp.zeros((1, HW), jnp.float32)
    for kh in range(3):                                      # static 3x3 stencil
        for kw in range(3):
            di, dj = kh - 1, kw - 1
            k = kh * 3 + kw
            w_mx = w_ref[k]          # weight on the max channel  (cin = 0)
            w_mn = w_ref[9 + k]      # weight on the mean channel (cin = 1)
            tap = w_mx * x_max + w_mn * x_mean               # (1, HW)
            # shifted(i) = tap[i + di*W + dj]  in flat row-major indexing
            shift = (-(di * W + dj)) % HW
            if shift:
                tap = pltpu.roll(tap, shift=shift, axis=1)
            acc = acc + tap * mask_ref[k]                    # zero the halo taps
    o_ref[0] = (1.0 / (1.0 + jnp.exp(-acc))).astype(o_ref.dtype)   # sigmoid


def spatial_attention_forward(x_nchw, w_oihw):
    """SpatialAttentionModule.forward: sigmoid(conv3x3(cat[max_c(x), mean_c(x)]))."""
    N, C, H, W = x_nchw.shape
    HW = H * W

    x_flat = x_nchw.reshape(N, C, HW).astype(jnp.float32)          # free reshape
    w_flat = w_oihw.reshape(-1).astype(jnp.float32)                # (18,)
    masks = jnp.asarray(_build_tap_masks(H, W)).reshape(9, 1, HW)  # (9, 1, HW)

    kernel = functools.partial(spatial_attention_kernel, H=H, W=W)

    out = pl.pallas_call(
        kernel,
        out_shape=jax.ShapeDtypeStruct((N, 1, HW), jnp.float32),
        grid=(N,),
        in_specs=[
            pl.BlockSpec(memory_space=pltpu.MemorySpace.SMEM),   # conv weights
            pl.BlockSpec((9, 1, HW), lambda n: (0, 0, 0)),       # tap halo masks
            pl.BlockSpec((1, C, HW), lambda n: (n, 0, 0)),       # one input image
        ],
        out_specs=pl.BlockSpec((1, 1, HW), lambda n: (n, 0, 0)),
        compiler_params=pltpu.CompilerParams(
            dimension_semantics=("parallel",)),                  # batch -> megacore
    )(w_flat, masks, x_flat)

    return out.reshape(N, 1, H, W)


def reference_forward(x_nchw, w_oihw):
    """Pure-JAX reference of SpatialAttentionModule.forward (NCHW)."""
    x1 = jnp.max(x_nchw, axis=1, keepdims=True)
    x2 = jnp.mean(x_nchw, axis=1, keepdims=True)
    xc = jnp.concatenate([x1, x2], axis=1).astype(jnp.float32)
    y = jax.lax.conv_general_dilated(
        xc, w_oihw.astype(jnp.float32),
        window_strides=(1, 1), padding=((1, 1), (1, 1)),
        dimension_numbers=("NCHW", "OIHW", "NCHW"))
    return jax.nn.sigmoid(y)


if __name__ == "__main__":
    key = jax.random.PRNGKey(0)
    k_x, k_w = jax.random.split(key)

    N, C, H, W = 2, 4, 16, 16
    x = jax.random.normal(k_x, (N, C, H, W), dtype=jnp.float32)
    # Conv2d(2, 1, kernel_size=3, padding=1, bias=False) weight (OIHW)
    w = jax.random.normal(k_w, (1, 2, 3, 3), dtype=jnp.float32) * 0.5

    out = spatial_attention_forward(x, w)
    out = jax.block_until_ready(out)

    ref = reference_forward(x, w)
    assert out.shape == (N, 1, H, W)
    assert jnp.allclose(out, ref, atol=1e-5, rtol=1e-5), (
        float(jnp.max(jnp.abs(out - ref))))

    print("KERNEL_OK")
</pallas_src>

<mosaic_0001>
module attributes {stable_mosaic.version = 11 : i64} {
  func.func @spatial_attention_kernel(%arg0: i32, %arg1: memref<18xf32, #tpu.memory_space<smem>>, %arg2: memref<9x1x256xf32, #tpu.memory_space<vmem>>, %arg3: memref<1x4x256xf32, #tpu.memory_space<vmem>>, %arg4: memref<1x1x256xf32, #tpu.memory_space<vmem>>) attributes {dimension_semantics = [#tpu.dimension_semantics<parallel>], iteration_bounds = array<i64: 2>, scalar_prefetch = 0 : i64, scratch_operands = 0 : i64, tpu.core_type = #tpu.core_type<tc>, window_params = [{transform_indices = @transform_0, window_bounds = array<i64: 18>}, {pipeline_mode = #tpu.pipeline_mode<synchronous>, transform_indices = @transform_1, window_bounds = array<i64: 9, 1, 256>}, {transform_indices = @transform_2, window_bounds = array<i64: 1, 4, 256>}, {transform_indices = @transform_3, window_bounds = array<i64: 1, 1, 256>}]} {
    %c0 = arith.constant 0 : index
    %c0_0 = arith.constant 0 : index
    %c0_1 = arith.constant 0 : index
    %0 = vector.load %arg3[%c0, %c0_0, %c0_1] : memref<1x4x256xf32, #tpu.memory_space<vmem>>, vector<1x4x256xf32>
    %1 = vector.shape_cast %0 : vector<1x4x256xf32> to vector<4x256xf32>
    %cst = arith.constant dense<0xFF800000> : vector<256xf32>
    %2 = vector.multi_reduction <maximumf>, %1, %cst [0] : vector<4x256xf32> to vector<256xf32>
    %3 = vector.shape_cast %2 : vector<256xf32> to vector<1x256xf32>
    %cst_2 = arith.constant dense<0.000000e+00> : vector<256xf32>
    %4 = vector.multi_reduction <add>, %1, %cst_2 [0] : vector<4x256xf32> to vector<256xf32>
    %5 = vector.shape_cast %4 : vector<256xf32> to vector<1x256xf32>
    %cst_3 = arith.constant 2.500000e-01 : f32
    %6 = vector.broadcast %cst_3 : f32 to vector<1x256xf32>
    %7 = arith.mulf %5, %6 : vector<1x256xf32>
    %cst_4 = arith.constant 0.000000e+00 : f32
    %8 = vector.broadcast %cst_4 : f32 to vector<1x256xf32>
    %c0_5 = arith.constant 0 : index
    %9 = memref.load %arg1[%c0_5] : memref<18xf32, #tpu.memory_space<smem>>
    %c9 = arith.constant 9 : index
    %10 = memref.load %arg1[%c9] : memref<18xf32, #tpu.memory_space<smem>>
    %11 = vector.broadcast %9 : f32 to vector<1x256xf32>
    %12 = arith.mulf %11, %3 : vector<1x256xf32>
    %13 = vector.broadcast %10 : f32 to vector<1x256xf32>
    %14 = arith.mulf %13, %7 : vector<1x256xf32>
    %15 = arith.addf %12, %14 : vector<1x256xf32>
    %c17_i32 = arith.constant 17 : i32
    %16 = tpu.dynamic_rotate %15 by %c17_i32 dim 1 : vector<1x256xf32>, i32 -> vector<1x256xf32>
    %c0_6 = arith.constant 0 : index
    %c0_7 = arith.constant 0 : index
    %c0_8 = arith.constant 0 : index
    %17 = vector.load %arg2[%c0_6, %c0_7, %c0_8] : memref<9x1x256xf32, #tpu.memory_space<vmem>>, vector<1x1x256xf32>
    %18 = vector.shape_cast %17 : vector<1x1x256xf32> to vector<1x256xf32>
    %19 = arith.mulf %16, %18 : vector<1x256xf32>
    %20 = arith.addf %8, %19 : vector<1x256xf32>
    %c1 = arith.constant 1 : index
    %21 = memref.load %arg1[%c1] : memref<18xf32, #tpu.memory_space<smem>>
    %c10 = arith.constant 10 : index
    %22 = memref.load %arg1[%c10] : memref<18xf32, #tpu.memory_space<smem>>
    %23 = vector.broadcast %21 : f32 to vector<1x256xf32>
    %24 = arith.mulf %23, %3 : vector<1x256xf32>
    %25 = vector.broadcast %22 : f32 to vector<1x256xf32>
    %26 = arith.mulf %25, %7 : vector<1x256xf32>
    %27 = arith.addf %24, %26 : vector<1x256xf32>
    %c16_i32 = arith.constant 16 : i32
    %28 = tpu.dynamic_rotate %27 by %c16_i32 dim 1 : vector<1x256xf32>, i32 -> vector<1x256xf32>
    %c1_9 = arith.constant 1 : index
    %c0_10 = arith.constant 0 : index
    %c0_11 = arith.constant 0 : index
    %29 = vector.load %arg2[%c1_9, %c0_10, %c0_11] : memref<9x1x256xf32, #tpu.memory_space<vmem>>, vector<1x1x256xf32>
    %30 = vector.shape_cast %29 : vector<1x1x256xf32> to vector<1x256xf32>
    %31 = arith.mulf %28, %30 : vector<1x256xf32>
    %32 = arith.addf %20, %31 : vector<1x256xf32>
    %c2 = arith.constant 2 : index
    %33 = memref.load %arg1[%c2] : memref<18xf32, #tpu.memory_space<smem>>
    %c11 = arith.constant 11 : index
    %34 = memref.load %arg1[%c11] : memref<18xf32, #tpu.memory_space<smem>>
    %35 = vector.broadcast %33 : f32 to vector<1x256xf32>
    %36 = arith.mulf %35, %3 : vector<1x256xf32>
    %37 = vector.broadcast %34 : f32 to vector<1x256xf32>
    %38 = arith.mulf %37, %7 : vector<1x256xf32>
    %39 = arith.addf %36, %38 : vector<1x256xf32>
    %c15_i32 = arith.constant 15 : i32
    %40 = tpu.dynamic_rotate %39 by %c15_i32 dim 1 : vector<1x256xf32>, i32 -> vector<1x256xf32>
    %c2_12 = arith.constant 2 : index
    %c0_13 = arith.constant 0 : index
    %c0_14 = arith.constant 0 : index
    %41 = vector.load %arg2[%c2_12, %c0_13, %c0_14] : memref<9x1x256xf32, #tpu.memory_space<vmem>>, vector<1x1x256xf32>
    %42 = vector.shape_cast %41 : vector<1x1x256xf32> to vector<1x256xf32>
    %43 = arith.mulf %40, %42 : vector<1x256xf32>
    %44 = arith.addf %32, %43 : vector<1x256xf32>
    %c3 = arith.constant 3 : index
    %45 = memref.load %arg1[%c3] : memref<18xf32, #tpu.memory_space<smem>>
    %c12 = arith.constant 12 : index
    %46 = memref.load %arg1[%c12] : memref<18xf32, #tpu.memory_space<smem>>
    %47 = vector.broadcast %45 : f32 to vector<1x256xf32>
    %48 = arith.mulf %47, %3 : vector<1x256xf32>
    %49 = vector.broadcast %46 : f32 to vector<1x256xf32>
    %50 = arith.mulf %49, %7 : vector<1x256xf32>
    %51 = arith.addf %48, %50 : vector<1x256xf32>
    %c1_i32 = arith.constant 1 : i32
    %52 = tpu.dynamic_rotate %51 by %c1_i32 dim 1 : vector<1x256xf32>, i32 -> vector<1x256xf32>
    %c3_15 = arith.constant 3 : index
    %c0_16 = arith.constant 0 : index
    %c0_17 = arith.constant 0 : index
    %53 = vector.load %arg2[%c3_15, %c0_16, %c0_17] : memref<9x1x256xf32, #tpu.memory_space<vmem>>, vector<1x1x256xf32>
    %54 = vector.shape_cast %53 : vector<1x1x256xf32> to vector<1x256xf32>
    %55 = arith.mulf %52, %54 : vector<1x256xf32>
    %56 = arith.addf %44, %55 : vector<1x256xf32>
    %c4 = arith.constant 4 : index
    %57 = memref.load %arg1[%c4] : memref<18xf32, #tpu.memory_space<smem>>
    %c13 = arith.constant 13 : index
    %58 = memref.load %arg1[%c13] : memref<18xf32, #tpu.memory_space<smem>>
    %59 = vector.broadcast %57 : f32 to vector<1x256xf32>
    %60 = arith.mulf %59, %3 : vector<1x256xf32>
    %61 = vector.broadcast %58 : f32 to vector<1x256xf32>
    %62 = arith.mulf %61, %7 : vector<1x256xf32>
    %63 = arith.addf %60, %62 : vector<1x256xf32>
    %c4_18 = arith.constant 4 : index
    %c0_19 = arith.constant 0 : index
    %c0_20 = arith.constant 0 : index
    %64 = vector.load %arg2[%c4_18, %c0_19, %c0_20] : memref<9x1x256xf32, #tpu.memory_space<vmem>>, vector<1x1x256xf32>
    %65 = vector.shape_cast %64 : vector<1x1x256xf32> to vector<1x256xf32>
    %66 = arith.mulf %63, %65 : vector<1x256xf32>
    %67 = arith.addf %56, %66 : vector<1x256xf32>
    %c5 = arith.constant 5 : index
    %68 = memref.load %arg1[%c5] : memref<18xf32, #tpu.memory_space<smem>>
    %c14 = arith.constant 14 : index
    %69 = memref.load %arg1[%c14] : memref<18xf32, #tpu.memory_space<smem>>
    %70 = vector.broadcast %68 : f32 to vector<1x256xf32>
    %71 = arith.mulf %70, %3 : vector<1x256xf32>
    %72 = vector.broadcast %69 : f32 to vector<1x256xf32>
    %73 = arith.mulf %72, %7 : vector<1x256xf32>
    %74 = arith.addf %71, %73 : vector<1x256xf32>
    %c255_i32 = arith.constant 255 : i32
    %75 = tpu.dynamic_rotate %74 by %c255_i32 dim 1 : vector<1x256xf32>, i32 -> vector<1x256xf32>
    %c5_21 = arith.constant 5 : index
    %c0_22 = arith.constant 0 : index
    %c0_23 = arith.constant 0 : index
    %76 = vector.load %arg2[%c5_21, %c0_22, %c0_23] : memref<9x1x256xf32, #tpu.memory_space<vmem>>, vector<1x1x256xf32>
    %77 = vector.shape_cast %76 : vector<1x1x256xf32> to vector<1x256xf32>
    %78 = arith.mulf %75, %77 : vector<1x256xf32>
    %79 = arith.addf %67, %78 : vector<1x256xf32>
    %c6 = arith.constant 6 : index
    %80 = memref.load %arg1[%c6] : memref<18xf32, #tpu.memory_space<smem>>
    %c15 = arith.constant 15 : index
    %81 = memref.load %arg1[%c15] : memref<18xf32, #tpu.memory_space<smem>>
    %82 = vector.broadcast %80 : f32 to vector<1x256xf32>
    %83 = arith.mulf %82, %3 : vector<1x256xf32>
    %84 = vector.broadcast %81 : f32 to vector<1x256xf32>
    %85 = arith.mulf %84, %7 : vector<1x256xf32>
    %86 = arith.addf %83, %85 : vector<1x256xf32>
    %c241_i32 = arith.constant 241 : i32
    %87 = tpu.dynamic_rotate %86 by %c241_i32 dim 1 : vector<1x256xf32>, i32 -> vector<1x256xf32>
    %c6_24 = arith.constant 6 : index
    %c0_25 = arith.constant 0 : index
    %c0_26 = arith.constant 0 : index
    %88 = vector.load %arg2[%c6_24, %c0_25, %c0_26] : memref<9x1x256xf32, #tpu.memory_space<vmem>>, vector<1x1x256xf32>
    %89 = vector.shape_cast %88 : vector<1x1x256xf32> to vector<1x256xf32>
    %90 = arith.mulf %87, %89 : vector<1x256xf32>
    %91 = arith.addf %79, %90 : vector<1x256xf32>
    %c7 = arith.constant 7 : index
    %92 = memref.load %arg1[%c7] : memref<18xf32, #tpu.memory_space<smem>>
    %c16 = arith.constant 16 : index
    %93 = memref.load %arg1[%c16] : memref<18xf32, #tpu.memory_space<smem>>
    %94 = vector.broadcast %92 : f32 to vector<1x256xf32>
    %95 = arith.mulf %94, %3 : vector<1x256xf32>
    %96 = vector.broadcast %93 : f32 to vector<1x256xf32>
    %97 = arith.mulf %96, %7 : vector<1x256xf32>
    %98 = arith.addf %95, %97 : vector<1x256xf32>
    %c240_i32 = arith.constant 240 : i32
    %99 = tpu.dynamic_rotate %98 by %c240_i32 dim 1 : vector<1x256xf32>, i32 -> vector<1x256xf32>
    %c7_27 = arith.constant 7 : index
    %c0_28 = arith.constant 0 : index
    %c0_29 = arith.constant 0 : index
    %100 = vector.load %arg2[%c7_27, %c0_28, %c0_29] : memref<9x1x256xf32, #tpu.memory_space<vmem>>, vector<1x1x256xf32>
    %101 = vector.shape_cast %100 : vector<1x1x256xf32> to vector<1x256xf32>
    %102 = arith.mulf %99, %101 : vector<1x256xf32>
    %103 = arith.addf %91, %102 : vector<1x256xf32>
    %c8 = arith.constant 8 : index
    %104 = memref.load %arg1[%c8] : memref<18xf32, #tpu.memory_space<smem>>
    %c17 = arith.constant 17 : index
    %105 = memref.load %arg1[%c17] : memref<18xf32, #tpu.memory_space<smem>>
    %106 = vector.broadcast %104 : f32 to vector<1x256xf32>
    %107 = arith.mulf %106, %3 : vector<1x256xf32>
    %108 = vector.broadcast %105 : f32 to vector<1x256xf32>
    %109 = arith.mulf %108, %7 : vector<1x256xf32>
    %110 = arith.addf %107, %109 : vector<1x256xf32>
    %c239_i32 = arith.constant 239 : i32
    %111 = tpu.dynamic_rotate %110 by %c239_i32 dim 1 : vector<1x256xf32>, i32 -> vector<1x256xf32>
    %c8_30 = arith.constant 8 : index
    %c0_31 = arith.constant 0 : index
    %c0_32 = arith.constant 0 : index
    %112 = vector.load %arg2[%c8_30, %c0_31, %c0_32] : memref<9x1x256xf32, #tpu.memory_space<vmem>>, vector<1x1x256xf32>
    %113 = vector.shape_cast %112 : vector<1x1x256xf32> to vector<1x256xf32>
    %114 = arith.mulf %111, %113 : vector<1x256xf32>
    %115 = arith.addf %103, %114 : vector<1x256xf32>
    %cst_33 = arith.constant 0.000000e+00 : f32
    %116 = vector.broadcast %cst_33 : f32 to vector<1x256xf32>
    %117 = arith.subf %116, %115 : vector<1x256xf32>
    %118 = math.exp %117 : vector<1x256xf32>
    %cst_34 = arith.constant 1.000000e+00 : f32
    %119 = vector.broadcast %cst_34 : f32 to vector<1x256xf32>
    %120 = arith.addf %119, %118 : vector<1x256xf32>
    %cst_35 = arith.constant 1.000000e+00 : f32
    %121 = vector.broadcast %cst_35 : f32 to vector<1x256xf32>
    %122 = arith.divf %121, %120 : vector<1x256xf32>
    %c0_36 = arith.constant 0 : index
    %c0_37 = arith.constant 0 : index
    %c0_38 = arith.constant 0 : index
    %123 = vector.load %arg4[%c0_36, %c0_37, %c0_38] : memref<1x1x256xf32, #tpu.memory_space<vmem>>, vector<1x1x256xf32>
    %124 = vector.shape_cast %123 : vector<1x1x256xf32> to vector<1x256xf32>
    %125 = vector.shape_cast %122 : vector<1x256xf32> to vector<1x1x256xf32>
    tpu.vector_store %arg4[%c0_36, %c0_37, %c0_38], %125 {strides = array<i32>} : memref<1x1x256xf32, #tpu.memory_space<vmem>>, vector<1x1x256xf32>,
    return
  }
  func.func @transform_0(%arg0: i32) -> i32 {
    %c0_i32 = arith.constant 0 : i32
    %c0_i32_0 = arith.constant 0 : i32
    return %c0_i32 : i32
  }
  func.func @transform_1(%arg0: i32) -> (i32, i32, i32) {
    %c0_i32 = arith.constant 0 : i32
    %c0_i32_0 = arith.constant 0 : i32
    %c0_i32_1 = arith.constant 0 : i32
    %c0_i32_2 = arith.constant 0 : i32
    return %c0_i32, %c0_i32_0, %c0_i32_1 : i32, i32, i32
  }
  func.func @transform_2(%arg0: i32) -> (i32, i32, i32) {
    %c0_i32 = arith.constant 0 : i32
    %c0_i32_0 = arith.constant 0 : i32
    %c0_i32_1 = arith.constant 0 : i32
    return %arg0, %c0_i32, %c0_i32_0 : i32, i32, i32
  }
  func.func @transform_3(%arg0: i32) -> (i32, i32, i32) {
    %c0_i32 = arith.constant 0 : i32
    %c0_i32_0 = arith.constant 0 : i32
    %c0_i32_1 = arith.constant 0 : i32
    return %arg0, %c0_i32, %c0_i32_0 : i32, i32, i32
  }
}

</mosaic_0001>

<bundles_post_ra>
// kernel: tpu_custom_call.1
= control target key start
LH: loop header
LB: loop body
LE: loop exit
PB: predicated region body
PF: predicated region fallthrough
CT: control target
= control target key end

     0   :  { %8 = vsyncpa [#allocation5], 0  ;;  %s1400_s0 = inlined_call_operand.hbm [shape: f32[18], index: 0, kind: input, shape index: {}]   ;;  %s1401_s1 = inlined_call_operand.hbm [shape: f32[9,1,256], index: 1, kind: input, shape index: {}]   ;;  %s1402_s2 = inlined_call_operand.hbm [shape: f32[2,4,256], index: 2, kind: input, shape index: {}]   ;;  %s1403_s3 = inlined_call_operand.hbm [shape: f32[2,1,256], index: 3, kind: output, shape index: {}]  }
   0x1   :  { %9 = vsyncpa [#allocation3], 0 }
   0x2   :  { %10 = vsyncpa [#allocation8], 0 }
   0x3   :  { %12 = vsyncpa [#allocation8 + $0x1], 0 }
   0x4   :  { %13 = vsyncpa [#allocation4], 0 }
   0x5   :  { %15 = vsyncpa [#allocation4 + $0x1], 0  ;;  %s999_s12 = smov 0   ;;  %s1001_s13 = smov 0  }
   0x6   :  { %s1003_s14 = smov 0   ;;  %s1005_s15 = smov 0  }
   0x7 LB: > { %s1020_s16 = sadd.s32 4294967295, %s962_s15   ;;  %s693_s17 = sadd.s32 4294967294, %s962_s15   ;;  %s962_s15 = sphi %s1005_s15, %s1425_s15   ;;  %s958_s14 = sphi %s1003_s14, %s1424_s14   ;;  %s954_s13 = sphi %s1001_s13, %s1423_s13   ;;  %s950_s12 = sphi %s999_s12, %s1422_s12  }
   0x8   : > { %p83_p0 = scmp.ne.s32.totalorder %s954_s13, %s950_s12  ;;  %p1404_p1 = scmp.eq.s32.totalorder %s1020_s16, 0 }
   0x9   : > { %p113_p3 = scmp.eq.s32.totalorder %s693_s17, 1  ;;  %p694_p5 = scmp.ge.s32.totalorder %s962_s15, 1 }
   0xa   : > { %p1029_p4 = por %p1404_p1, %p83_p0  ;;  %p120_p7 = scmp.lt.s32.totalorder %s962_s15, 3 }
   0xb   : > { %p1034_p6 = por %p113_p3, %p83_p0  ;;  %s964_s21 = smov [#allocation6]  }
   0xc   : > { %s1407_s18 = scalar_select %p1029_p4, 1, 0 }
   0xd   : > { %s1408_s19 = scalar_select %p1034_p6, 1, 0 }
   0xe   : > { %p1039_p8 = pnand %p694_p5, %p120_p7  ;;  %s141_s22 = sshll.u32 %s964_s21, 4  ;;  %s1046_s22 = int_to_ptr.vmem [resolvable:$true] %s141_s22 }
   0xf   : > { %s1055_s24 = sadd.s32 1, %s962_s15   ;;  %s817_s28 = scalar_lea.hbm %s1400_s0, 16 }
  0x10   : > { %p742_p10 = pneg %p1039_p8  ;;  %s67_s25 = ssub.s32 %s962_s15, %s1055_s24 }
  0x11   : > { %p818_p12 = scmp.ne.s32.totalorder %s1400_s0, %s817_s28  ;;  %p824_p5 = scmp.lt.u32.totalorder %s817_s28, %s1400_s0 }
  0x12   : > { %p1050_p11 = pnand %p742_p10, %p1404_p1 }
  0x14   : > { %p819_p13 = pneg %p1050_p11 }
  0x16   : > { %p820_p0 = pnand %p819_p13, %p818_p12 }
  0x18   : > { %p821_p3 = pneg %p820_p0 }
  0x1a   : > { %p826_p7 = pnand %p824_p5, %p821_p3 }
  0x1c   : > { %829 = shalt.err (!%p826_p7)
}
  0x1d   : > { %s965_s6 = smov [#allocation2]   ;;  %s830_s11 = scalar_lea.hbm %s1401_s1, 288 }
  0x1e   : > { %745 = dma.hbm_to_smem (!%p1050_p11), %s1400_s0, 16, %s965_s6, [#allocation5]  }
  0x1f   : > { %p831_p10 = scmp.ne.s32.totalorder %s1401_s1, %s830_s11  ;;  %p837_p3 = scmp.lt.u32.totalorder %s830_s11, %s1401_s1 }
  0x21   : > { %p833_p12 = pnand %p831_p10, %p819_p13 }
  0x23   : > { %p834_p0 = pneg %p833_p12 }
  0x25   : > { %p839_p5 = pnand %p837_p3, %p834_p0 }
  0x27   : > { %842 = shalt.err (!%p839_p5)
}
  0x28   : > { %s843_s28 = scalar_lea.vmem %s1046_s22, 288  ;;  %p851_p2 = scmp.lt.s32.totalorder %s1046_s22, %s1046_s22 }
  0x29   : > { %p844_p7 = scmp.ne.s32.totalorder %s1046_s22, %s843_s28  ;;  %p852_p10 = scmp.lt.s32.totalorder %s843_s28, %s843_s28 }
  0x2b   : > { %p846_p9 = pnand %p844_p7, %p819_p13  ;;  %p853_p12 = por %p852_p10, %p851_p2 }
  0x2d   : > { %p847_p1 = pneg %p846_p9 }
  0x2f   : > { %p854_p6 = pnand %p853_p12, %p847_p1 }
  0x31   : > { %857 = shalt.err (!%p854_p6)
}
  0x32   : > { %s966_s29 = smov 32   ;;  %s967_s30 = smov 2  }
  0x33   : > { %748 = dma.hbm_to_vmem [thread:$0]  (!%p1050_p11), %s1401_s1, 288, %s1046_s22, [#allocation3], %s966_s29, %s966_s29, %s967_s30  }
  0x34   : > { %p68_p1 = scmp.eq.s32.totalorder %s67_s25, 0  ;;  %s70_s6 = sadd.s32 1, %s958_s14 }
  0x35   : > { %p77_p2 = scmp.ne.s32.totalorder %s958_s14, %s954_s13  ;;  %p78_p6 = scmp.eq.s32.totalorder %s962_s15, 0 }
  0x36   : > { %s1111_s7 = scalar_select %p68_p1, %s958_s14, %s70_s6  }
  0x37   : > { %p79_p9 = por %p78_p6, %p77_p2  ;;  %p1411_p13 = scmp.eq.s32.totalorder %s1020_s16, 1 }
  0x38   : > { %p759_p3 = scmp.lt.s32.totalorder %s962_s15, 2  ;;  %s155_s9 = sand.u32 1, %s958_s14  }
  0x39   : > { %p1115_p0 = por %p1411_p13, %p77_p2  ;;  %s698_s23 = sshll.u32 %s155_s9, 3 }
  0x3a   : > { %s728_s10 = sshll.u32 %s962_s15, 7  ;;  %s159_s25 = scalar_lea.vmem [#allocation7], %s698_s23 }
  0x3b   : > { %s1412_s8 = scalar_select %p1115_p0, 1, 0 }
  0x3c   : > { %s1125_s22 = scalar_lea.hbm %s1402_s2, %s728_s10  ;;  %s167_s21 = sshll.u32 %s159_s25, 4  ;;  %s1127_s21 = int_to_ptr.vmem [resolvable:$true] %s167_s21 }
  0x3d   : > { %p1129_p11 = pnand %p759_p3, %p79_p9  ;;  %s156_s27 = scalar_lea.sflag [#allocation8], %s155_s9 }
  0x3e   : > { %s858_s28 = scalar_lea.hbm %s1125_s22, 128  ;;  %s863_s4 = scalar_lea.hbm %s1402_s2, 256 }
  0x3f   : > { %p859_p5 = scmp.ne.s32.totalorder %s1125_s22, %s858_s28  ;;  %p860_p7 = pneg %p1129_p11 }
  0x40   : > { %p864_p1 = scmp.lt.u32.totalorder %s1125_s22, %s1402_s2  ;;  %p865_p2 = scmp.lt.u32.totalorder %s863_s4, %s858_s28 }
  0x41   : > { %p861_p10 = pnand %p860_p7, %p859_p5  ;;  %p867_p9 = scmp.lt.u32.totalorder %s858_s28, %s1125_s22 }
  0x42   : > { %p866_p6 = por %p865_p2, %p864_p1 }
  0x43   : > { %p862_p12 = pneg %p861_p10 }
  0x44   : > { %p868_p13 = por %p867_p9, %p866_p6 }
  0x46   : > { %p869_p3 = pnand %p868_p13, %p862_p12 }
  0x48   : > { %872 = shalt.err (!%p869_p3)
}
  0x49   : > { %s873_s9 = scalar_lea.vmem %s1127_s21, 128  ;;  %s968_s23 = smov [#allocation7]  }
  0x4a   : > { %p874_p5 = scmp.ne.s32.totalorder %s1127_s21, %s873_s9  ;;  %s878_s10 = sshll.u32 %s968_s23, 4  ;;  %s879_s10 = int_to_ptr.vmem [resolvable:$false] %s878_s10 }
  0x4b   : > { %s880_s11 = scalar_lea.vmem %s879_s10, 256  ;;  %p881_p4 = scmp.lt.s32.totalorder %s1127_s21, %s879_s10 }
  0x4c   : > { %p876_p10 = pnand %p874_p5, %p860_p7  ;;  %p882_p1 = scmp.lt.s32.totalorder %s880_s11, %s873_s9 }
  0x4e   : > { %p877_p0 = pneg %p876_p10  ;;  %p883_p2 = por %p882_p1, %p881_p4 }
  0x50   : > { %p884_p6 = pnand %p883_p2, %p877_p0 }
  0x52   : > { %887 = shalt.err (!%p884_p6)
}
  0x53   : > { %752 = dma.hbm_to_vmem [thread:$0]  (!%p1129_p11), %s1125_s22, 128, %s1127_s21, %s156_s27  }
  0x54   : > { %176 = sbr.rel (%p1039_p8) target bundleno = 318 (0x13e), region = 32  ;;  %p1414_p7 = scmp.eq.s32.totalorder (!%p1039_p8), %s1020_s16, 0 }
  0x5b   : > { %933 = dma.done.wait (%p1414_p7), [#allocation5], 16   ;;  %p1415_p12 = pmov %p1414_p7 }
  0x5c   : > { %p1416_p9 = pmov %p1414_p7 }
  0x5d   : > { %935 = vsyncadd (%p1415_p12), [#allocation5], 4294967280 }
  0x5e   : > { %937 = dma.done.wait (%p1416_p9), [#allocation3], 288   ;;  %p1417_p4 = pmov %p1414_p7 }
  0x5f   : > { %s1169_s17 = sand.u32 1, %s954_s13   ;;  %p1418_p8 = scmp.ne.s32.totalorder %s1407_s18, 0 }
  0x60   : > { %939 = vsyncadd (%p1417_p4), [#allocation3], 4294967008  ;;  %s704_s20 = sshll.u32 %s1169_s17, 3  ;;  %s187_s22 = scalar_lea.sflag [#allocation8], %s1169_s17 }
  0x61   : > { %s190_s25 = scalar_lea.vmem [#allocation7], %s704_s20 }
  0x62   : > { %941 = dma.done.wait (%p1418_p8), %s187_s22, 128  }
  0x63   : > { %943 = vsyncadd (%p1418_p8), %s187_s22, 4294967168 }
  0x64   : > { %195 = sfence }
  0x65   : > { %v214_v0 = vld [vmem:[%s190_s25] sm:$0xff]  ;;  %vm218_vm0 = vcmask 1043456   ;;  %s1177_s21 = sld [smem:[#allocation2 + $0x1]]  ;;  %s1179_s26 = sld [smem:[#allocation2]] }
  0x66   : > { %v219_v1 = vsel %vm218_vm0, %v214_v0, -inf  ;;  %v233_v2 = vsel %vm218_vm0, %v214_v0, 0.0  ;;  %v216_v3 = vcombine.high %v214_v0, %v214_v0  ;;  %s1181_s27 = sld [smem:[#allocation2 + $0xa]]  ;;  %s1183_s18 = sld [smem:[#allocation2 + $0x9]] }
  0x67   : > { %v220_v4 = vrot.slane %v219_v1, 4  ;;  %v234_v5 = vrot.slane %v233_v2, 4  ;;  %s1185_s28 = sld [smem:[#allocation2 + $0x2]]  ;;  %s1187_s29 = sld [smem:[#allocation2 + $0xb]] }
  0x68   : > { %v226_v6 = vsel %vm218_vm0, %v216_v3, -inf  ;;  %v240_v7 = vsel %vm218_vm0, %v216_v3, 0.0  ;;  %s1189_s30 = sld [smem:[#allocation2 + $0x3]]  ;;  %s1191_s4 = sld [smem:[#allocation2 + $0xc]] }
  0x69   : > { %v221_v8 = vmax.f32 %v219_v1, %v220_v4  ;;  %v235_v9 = vadd.f32 %v234_v5, %v233_v2  ;;  %v227_v10 = vrot.slane %v226_v6, 4  ;;  %v241_v11 = vrot.slane %v240_v7, 4  ;;  %s1205_s5 = sld [smem:[#allocation2 + $0x5]]  ;;  %s1207_s6 = sld [smem:[#allocation2 + $0xe]] }
  0x6a   : > { %s1223_s9 = sld [smem:[#allocation2 + $0x6]]  ;;  %s1225_s23 = sld [smem:[#allocation2 + $0xf]] }
  0x6b   : > { %v222_v12 = vrot.slane %v221_v8, 2  ;;  %v236_v13 = vrot.slane %v235_v9, 2  ;;  %v228_v14 = vmax.f32 %v226_v6, %v227_v10  ;;  %v242_v15 = vadd.f32 %v241_v11, %v240_v7  ;;  %s969_s10 = smov 16   ;;  %s970_s11 = smov 17  }
  0x6c   : > { %v286_v22 = vstv %s1177_s21  ;;  %v251_v25 = vstv %s1179_s26  ;;  %v289_v28 = vstv %s1181_s27  ;;  %v254_v29 = vstv %s1183_s18  ;;  %s1232_s20 = sld [smem:[#allocation2 + $0x7]]  ;;  %s1236_s22 = sld [smem:[#allocation2 + $0x4]] }
  0x6d   : > { %v223_v16 = vmax.f32 %v221_v8, %v222_v12  ;;  %v237_v17 = vadd.f32 %v236_v13, %v235_v9  ;;  %v229_v18 = vrot.slane %v228_v14, 2  ;;  %v243_v19 = vrot.slane %v242_v15, 2  ;;  %s1238_s25 = sld [smem:[#allocation2 + $0xd]]  ;;  %s971_s21 = smov 15  }
  0x6e   : > { %v320_v32 = vstv %s1185_s28  ;;  %v323_v33 = vstv %s1187_s29  ;;  %v354_v39 = vstv %s1189_s30  ;;  %v357_v40 = vstv %s1191_s4  ;;  %s1242_s26 = sld [smem:[#allocation2 + $0x10]]  ;;  %s972_s27 = smov 1  }
  0x6f   : > { %v224_v20 = vrot.slane %v223_v16, 1  ;;  %v238_v21 = vrot.slane %v237_v17, 1  ;;  %v230_v23 = vmax.f32 %v228_v14, %v229_v18  ;;  %v244_v24 = vadd.f32 %v243_v19, %v242_v15  ;;  %s1250_s18 = sld [smem:[#allocation2 + $0x8]]  ;;  %s1252_s28 = sld [smem:[#allocation2 + $0x11]] }
  0x70   : > { %v415_v56 = vstv %s1205_s5  ;;  %v418_v57 = vstv %s1207_s6  ;;  %v449_v4 = vstv %s1223_s9  ;;  %v452_v5 = vstv %s1225_s23  ;;  %s973_s29 = smov 127   ;;  %s974_s30 = smov 113  }
  0x71   : > { %v1195_v26 = vmax.f32 %v223_v16, %v224_v20  ;;  %v239_v27 = vadd.f32 %v238_v21, %v237_v17  ;;  %v231_v30 = vrot.slane %v230_v23, 1  ;;  %v245_v31 = vrot.slane %v244_v24, 1  ;;  %s975_s4 = smov 112   ;;  %s976_s5 = smov 111  }
  0x72   : > { %v483_v14 = vstv %s1232_s20  ;;  %v388_v15 = vstv %s1236_s22  ;;  %s705_s6 = sshll.u32 %s1169_s17, 1  ;;  %s729_s9 = sshll.u32 %s1020_s16, 5 }
  0x73   : > { %v1201_v34 = vmul.f32 0.25, %v239_v27  ;;  %v287_v35 = vmul.f32 %v286_v22, %v1195_v26  ;;  %v252_v36 = vmul.f32 %v251_v25, %v1195_v26  ;;  %v1209_v37 = vmax.f32 %v230_v23, %v231_v30  ;;  %s213_s23 = scalar_lea.vmem [#allocation9], %s705_s6  ;;  %s1356_s22 = scalar_lea.hbm %s1403_s3, %s729_s9 }
  0x74   : > { %v246_v38 = vadd.f32 %v245_v31, %v244_v24  ;;  %v321_v43 = vmul.f32 %v320_v32, %v1195_v26  ;;  %v355_v50 = vmul.f32 %v354_v39, %v1195_v26  ;;  %v416_v2 = vmul.f32 %v415_v56, %v1195_v26  ;;  %p1419_p11 = scmp.ne.s32.totalorder %s1412_s8, 0  ;;  %s978_s16 = smov [#allocation9]  }
  0x75   : > { %v290_v41 = vmul.f32 %v289_v28, %v1201_v34  ;;  %v255_v42 = vmul.f32 %v254_v29, %v1201_v34  ;;  %v324_v44 = vmul.f32 %v323_v33, %v1201_v34  ;;  %v288_v46 = vmul.f32 %v286_v22, %v1209_v37 }
  0x76   : > { %v1217_v45 = vmul.f32 0.25, %v246_v38  ;;  %v358_v51 = vmul.f32 %v357_v40, %v1201_v34  ;;  %v322_v53 = vmul.f32 %v320_v32, %v1209_v37  ;;  %v253_v58 = vmul.f32 %v251_v25, %v1209_v37 }
  0x77   : > { %v292_v47 = vadd.f32 %v290_v41, %v287_v35  ;;  %v257_v48 = vadd.f32 %v255_v42, %v252_v36  ;;  %v326_v52 = vadd.f32 %v324_v44, %v321_v43  ;;  %v356_v62 = vmul.f32 %v354_v39, %v1209_v37 }
  0x78   : > { %v291_v49 = vmul.f32 %v289_v28, %v1217_v45  ;;  %v325_v54 = vmul.f32 %v323_v33, %v1217_v45  ;;  %v256_v59 = vmul.f32 %v254_v29, %v1217_v45  ;;  %v360_v60 = vadd.f32 %v358_v51, %v355_v50  ;;  %v336_v50 = vld [vmem:[#allocation6 + $0x4] sm:$0x3]  ;;  %v268_v51 = vld [vmem:[#allocation6] sm:$0x3] }
  0x79   : > { %294 = vrot.lane.b32.xlu1 %v292_v47, %s969_s10  ;;  %259 = vrot.lane.b32.xlu0 %v257_v48, %s970_s11  ;;  %v359_v63 = vmul.f32 %v357_v40, %v1217_v45  ;;  %v417_v0 = vmul.f32 %v415_v56, %v1209_v37  ;;  %v420_v1 = vmul.f32 %v418_v57, %v1217_v45  ;;  %v391_v16 = vstv %s1238_s25  ;;  %v370_v56 = vld [vmem:[#allocation6 + $0x6] sm:$0x3]  ;;  %s585_s25 = scalar_lea.sflag [#allocation4], %s1169_s17 }
  0x7a   : > { %v293_v55 = vadd.f32 %v291_v49, %v288_v46  ;;  %v327_v61 = vadd.f32 %v325_v54, %v322_v53  ;;  %v419_v3 = vmul.f32 %v418_v57, %v1201_v34  ;;  %v258_v7 = vadd.f32 %v256_v59, %v253_v58  ;;  %v302_v49 = vld [vmem:[#allocation6 + $0x2] sm:$0x3]  ;;  %v397_v57 = vld [vmem:[#allocation6 + $0x8] sm:$0x3] }
  0x7b   : > { %v361_v6 = vadd.f32 %v359_v63, %v356_v62  ;;  %v422_v8 = vadd.f32 %v420_v1, %v417_v0  ;;  %v451_v10 = vmul.f32 %v449_v4, %v1209_v37  ;;  %v454_v11 = vmul.f32 %v452_v5, %v1217_v45 }
  0x7c   : > { %v421_v9 = vadd.f32 %v419_v3, %v416_v2  ;;  %v450_v12 = vmul.f32 %v449_v4, %v1195_v26  ;;  %v453_v13 = vmul.f32 %v452_v5, %v1201_v34  ;;  %v486_v17 = vstv %s1242_s26  ;;  %s892_s26 = sshll.u32 %s978_s16, 4  ;;  %s893_s26 = int_to_ptr.vmem [resolvable:$false] %s892_s26 }
  0x7d   : > { %328 = vrot.lane.b32.xlu0 %v326_v52, %s971_s21  ;;  %296 = vrot.lane.b32.xlu1 %v293_v55, %s969_s10  ;;  %v389_v18 = vmul.f32 %v388_v15, %v1195_v26  ;;  %v390_v19 = vmul.f32 %v388_v15, %v1209_v37  ;;  %v392_v20 = vmul.f32 %v391_v16, %v1201_v34  ;;  %v517_v31 = vstv %s1250_s18  ;;  %s599_s10 = sshll.u32 %s213_s23, 4  ;;  %s1358_s10 = int_to_ptr.vmem [resolvable:$true] %s599_s10 }
  0x7e   : > { %v393_v21 = vmul.f32 %v391_v16, %v1217_v45  ;;  %v456_v23 = vadd.f32 %v454_v11, %v451_v10  ;;  %v485_v24 = vmul.f32 %v483_v14, %v1209_v37  ;;  %v488_v25 = vmul.f32 %v486_v17, %v1217_v45  ;;  %p895_p5 = scmp.lt.s32.totalorder %s1358_s10, %s893_s26 }
  0x7f   : > { %v1267_v22 = vadd.f32 %v392_v20, %v389_v18  ;;  %v455_v28 = vadd.f32 %v453_v13, %v450_v12  ;;  %v484_v29 = vmul.f32 %v483_v14, %v1195_v26  ;;  %v487_v30 = vmul.f32 %v486_v17, %v1201_v34 }
  0x80   : > { %v1271_v27 = vadd.f32 %v393_v21, %v390_v19  ;;  %v520_v32 = vstv %s1252_s28  ;;  %v490_v33 = vadd.f32 %v488_v25, %v485_v24  ;;  %v519_v35 = vmul.f32 %v517_v31, %v1209_v37  ;;  %v465_v25 = vld [vmem:[#allocation6 + $0xc] sm:$0x3] }
  0x81   : > { %362 = vrot.lane.b32.xlu0 %v360_v60, %s972_s27  ;;  %330 = vrot.lane.b32.xlu1 %v327_v61, %s971_s21  ;;  %v518_v36 = vmul.f32 %v517_v31, %v1195_v26  ;;  %v489_v38 = vadd.f32 %v487_v30, %v484_v29  ;;  %v522_v39 = vmul.f32 %v520_v32, %v1217_v45  ;;  %v263_v43 = vlaneseq  ;;  %s888_s21 = scalar_lea.vmem %s1358_s10, 32 }
  0x82   : > { %v521_v40 = vmul.f32 %v520_v32, %v1201_v34  ;;  %p889_p0 = scmp.ne.s32.totalorder %s1358_s10, %s888_s21 }
  0x83   : > { %v524_v41 = vadd.f32 %v522_v39, %v519_v35  ;;  %v1282_v26 = vshrl.u32 %v263_v43, 7  ;;  %v1285_v47 = vand.u32 127, %v263_v43  ;;  %vm581_vm9 = vcmp.lt.s32.totalorder %v263_v43, 256 }
  0x84   : > { %v523_v42 = vadd.f32 %v521_v40, %v518_v36  ;;  %v499_v36 = vld [vmem:[#allocation6 + $0xe] sm:$0x3]  ;;  %p890_p13 = pnand %p889_p0, %p1419_p11 }
  0x85   : > { %364 = vrot.lane.b32.xlu1 %v361_v6, %s972_s27  ;;  %261 = vrot.lane.b32.xlu0 %v258_v7, %s970_s11  ;;  %v1288_v34 = vsub.s32 0, %v1282_v26  ;;  %v1291_v48 = vsub.s32 1, %v1282_v26  ;;  %vm298_vm1 = vcmp.lt.s32.totalorder %v1285_v47, 16  ;;  %vm332_vm2 = vcmp.lt.s32.totalorder %v1285_v47, 15  ;;  %v431_v6 = vld [vmem:[#allocation6 + $0xa] sm:$0x3] }
  0x86   : > { %vm265_vm3 = vcmp.lt.s32.totalorder %v1285_v47, 17  ;;  %vm366_vm4 = vcmp.lt.s32.totalorder %v1285_v47, 1  ;;  %vm427_vm5 = vcmp.lt.s32.totalorder %v1285_v47, 127  ;;  %vm461_vm6 = vcmp.lt.s32.totalorder %v1285_v47, 113  ;;  %p891_p3 = pneg %p890_p13  ;;  %s894_s27 = scalar_lea.vmem %s893_s26, 64 }
  0x87   : > { %v307_v54 = vrot.slane %v302_v49, %v1288_v34  ;;  %v311_v55 = vrot.slane %v302_v49, %v1291_v48  ;;  %v341_v58 = vrot.slane %v336_v50, %v1288_v34  ;;  %v273_v59 = vrot.slane %v268_v51, %v1288_v34  ;;  %p896_p10 = scmp.lt.s32.totalorder %s894_s27, %s888_s21 }
  0x88   : > { %v277_v60 = vrot.slane %v268_v51, %v1291_v48  ;;  %v345_v63 = vrot.slane %v336_v50, %v1291_v48  ;;  %v375_v0 = vrot.slane %v370_v56, %v1288_v34  ;;  %v379_v1 = vrot.slane %v370_v56, %v1291_v48 }
  0x89   : > { %425 = vrot.lane.b32.xlu1 %v422_v8, %s973_s29  ;;  %423 = vrot.lane.b32.xlu0 %v421_v9, %s973_s29  ;;  %v402_v4 = vrot.slane %v397_v57, %v1288_v34  ;;  %v406_v5 = vrot.slane %v397_v57, %v1291_v48  ;;  %v436_v17 = vrot.slane %v431_v6, %v1288_v34  ;;  %vm495_vm7 = vcmp.lt.s32.totalorder %v1285_v47, 112  ;;  %p897_p1 = por %p896_p10, %p895_p5 }
  0x8a   : > { %v440_v30 = vrot.slane %v431_v6, %v1291_v48  ;;  %v470_v40 = vrot.slane %v465_v25, %v1288_v34  ;;  %v508_v49 = vrot.slane %v499_v36, %v1291_v48  ;;  %vm529_vm8 = vcmp.lt.s32.totalorder %v1285_v47, 111 }
  0x8b   : > { %v410_v29 = vmul.f32 %v406_v5, %v1271_v27  ;;  %v977_v47 = vmov 1966171168   ;;  %p898_p2 = pnand %p897_p1, %p891_p3 }
  0x8d   : > { %459 = vrot.lane.b32.xlu1 %v456_v23, %s974_s30  ;;  %457 = vrot.lane.b32.xlu0 %v455_v28, %s974_s30  ;;  %v409_v28 = vmul.f32 %v402_v4, %v1267_v22 }
  0x91   : > { %493 = vrot.lane.b32.xlu1 %v490_v33, %s975_s4  ;;  %491 = vrot.lane.b32.xlu0 %v489_v38, %s975_s4 }
  0x95   : > { %527 = vrot.lane.b32.xlu1 %v524_v41, %s976_s5  ;;  %525 = vrot.lane.b32.xlu0 %v523_v42, %s976_s5  ;;  %v474_v42 = vrot.slane %v465_v25, %v1291_v48 }
  0xeb   : > { %v295_v37 = vpop.permute.xlu1 %294  ;;  %v260_v44 = vpop.permute.xlu0 %259 }
  0xef   : > { %v329_v46 = vpop.permute.xlu0 %328  ;;  %v297_v45 = vpop.permute.xlu1 %296 }
  0xf0   : > { %v299_v61 = vsel %vm298_vm1, %v295_v37, %v297_v45  ;;  %v300_v62 = vsel %vm298_vm1, %v297_v45, %v295_v37  ;;  %v504_v45 = vrot.slane %v499_v36, %v1288_v34 }
  0xf1   : > { %v314_v11 = vmul.f32 %v307_v54, %v300_v62  ;;  %v315_v12 = vmul.f32 %v311_v55, %v299_v61  ;;  %v533_v54 = vld [vmem:[#allocation6 + $0x10] sm:$0x3] }
  0xf3   : > { %v363_v52 = vpop.permute.xlu0 %362  ;;  %v331_v53 = vpop.permute.xlu1 %330 }
  0xf4   : > { %v333_v7 = vsel %vm332_vm2, %v329_v46, %v331_v53  ;;  %v334_v8 = vsel %vm332_vm2, %v331_v53, %v329_v46 }
  0xf5   : > { %v348_v18 = vmul.f32 %v341_v58, %v334_v8  ;;  %v349_v19 = vmul.f32 %v345_v63, %v333_v7  ;;  %v538_v63 = vrot.slane %v533_v54, %v1288_v34 }
  0xf7   : > { %v365_v2 = vpop.permute.xlu1 %364  ;;  %v262_v3 = vpop.permute.xlu0 %261 }
  0xf8   : > { %v266_v9 = vsel %vm265_vm3, %v260_v44, %v262_v3  ;;  %v267_v10 = vsel %vm265_vm3, %v262_v3, %v260_v44  ;;  %v367_v15 = vsel %vm366_vm4, %v363_v52, %v365_v2  ;;  %v368_v16 = vsel %vm366_vm4, %v365_v2, %v363_v52 }
  0xf9   : > { %v280_v13 = vmul.f32 %v273_v59, %v267_v10  ;;  %v281_v14 = vmul.f32 %v277_v60, %v266_v9  ;;  %v382_v31 = vmul.f32 %v375_v0, %v368_v16  ;;  %v383_v32 = vmul.f32 %v379_v1, %v367_v15 }
  0xfa   : > { %v542_v0 = vrot.slane %v533_v54, %v1291_v48 }
  0xfb   : > { %v316_v20 = vadd.f32 %v314_v11, %v280_v13  ;;  %v317_v21 = vadd.f32 %v315_v12, %v281_v14  ;;  %v426_v23 = vpop.permute.xlu1 %425  ;;  %v424_v24 = vpop.permute.xlu0 %423 }
  0xfc   : > { %v428_v38 = vsel %vm427_vm5, %v424_v24, %v426_v23  ;;  %v429_v39 = vsel %vm427_vm5, %v426_v23, %v424_v24 }
  0xfd   : > { %v350_v33 = vadd.f32 %v348_v18, %v316_v20  ;;  %v351_v35 = vadd.f32 %v349_v19, %v317_v21  ;;  %v443_v52 = vmul.f32 %v436_v17, %v428_v38  ;;  %v444_v53 = vmul.f32 %v440_v30, %v429_v39 }
  0xfe   : > { %v565_v21 = vunpack.c.l.s4 %v977_v47 }
  0xff   : > { %v384_v22 = vadd.f32 %v382_v31, %v350_v33  ;;  %v385_v41 = vadd.f32 %v383_v32, %v351_v35  ;;  %v460_v27 = vpop.permute.xlu1 %459  ;;  %v458_v37 = vpop.permute.xlu0 %457 }
 0x100   : > { %v462_v44 = vsel %vm461_vm6, %v458_v37, %v460_v27  ;;  %v463_v46 = vsel %vm461_vm6, %v460_v27, %v458_v37  ;;  %v566_v23 = vunpack.c.0.s8 %v565_v21 }
 0x101   : > { %v411_v50 = vadd.f32 %v409_v28, %v384_v22  ;;  %v412_v51 = vadd.f32 %v410_v29, %v385_v41  ;;  %v477_v57 = vmul.f32 %v470_v40, %v462_v44  ;;  %v478_v58 = vmul.f32 %v474_v42, %v463_v46 }
 0x102   : > { %v569_v25 = vsub.s32 %v566_v23, %v1282_v26 }
 0x103   : > { %v445_v55 = vadd.f32 %v443_v52, %v411_v50  ;;  %v446_v56 = vadd.f32 %v444_v53, %v412_v51  ;;  %v494_v59 = vpop.permute.xlu1 %493  ;;  %v492_v60 = vpop.permute.xlu0 %491 }
 0x104   : > { %v496_v61 = vsel %vm495_vm7, %v492_v60, %v494_v59  ;;  %v497_v62 = vsel %vm495_vm7, %v494_v59, %v492_v60 }
 0x105   : > { %v479_v1 = vadd.f32 %v477_v57, %v445_v55  ;;  %v480_v2 = vadd.f32 %v478_v58, %v446_v56  ;;  %v511_v3 = vmul.f32 %v504_v45, %v496_v61  ;;  %v512_v4 = vmul.f32 %v508_v49, %v497_v62 }
 0x107   : > { %v528_v5 = vpop.permute.xlu1 %527  ;;  %v526_v6 = vpop.permute.xlu0 %525  ;;  %v513_v9 = vadd.f32 %v511_v3, %v479_v1  ;;  %v514_v10 = vadd.f32 %v512_v4, %v480_v2 }
 0x108   : > { %v530_v7 = vsel %vm529_vm8, %v526_v6, %v528_v5  ;;  %v531_v8 = vsel %vm529_vm8, %v528_v5, %v526_v6 }
 0x109   : > { %v545_v11 = vmul.f32 %v538_v63, %v530_v7  ;;  %v546_v12 = vmul.f32 %v542_v0, %v531_v8 }
 0x10b   : > { %v547_v13 = vadd.f32 %v545_v11, %v513_v9  ;;  %v548_v34 = vadd.f32 %v546_v12, %v514_v10 }
 0x10d   : > { %v549_v48 = vsub.f32 0.0, %v547_v13  ;;  %v550_v14 = vsub.f32 0.0, %v548_v34 }
 0x10f   : > { %v551_v15 = vmul.f32 1.442695, %v549_v48  ;;  %v553_v16 = vmul.f32 1.442695, %v550_v14 }
 0x111   : > { %809 = vpow2.f32 %v551_v15 }
 0x112   : > { %811 = vpow2.f32 %v553_v16 }
 0x11b   : > { %v810_v17 = vpop.eup %809 }
 0x11c   : > { %v812_v18 = vpop.eup %811  ;;  %v555_v19 = vadd.f32 1.0, %v810_v17 }
 0x11d   : > { %v556_v20 = vadd.f32 1.0, %v812_v18 }
 0x11e   : > { %813 = vrcp.f32 %v555_v19 }
 0x11f   : > { %815 = vrcp.f32 %v556_v20 }
 0x128   : > { %v814_v24 = vpop.eup %813 }
 0x129   : > { %v816_v28 = vpop.eup %815 }
 0x12a   : > { %v563_v29 = vcombine.low %v814_v24, %v816_v28 }
 0x12c   : > { %v570_v30 = vrot.slane %v563_v29, %v569_v25 }
 0x12e   : > { %v577_v31 = vrot.slane %v570_v30, %v569_v25 }
 0x130   : > { %583 = vst.msk [vmem:[%s213_s23] sm:$0x3] %vm581_vm9, %v577_v31 }
 0x131   : > { %901 = shalt.err (!%p898_p2)
}
 0x132   : > { %s902_s17 = scalar_lea.hbm %s1356_s22, 32  ;;  %s906_s29 = scalar_lea.hbm %s1403_s3, 64 }
 0x133   : > { %p903_p6 = scmp.ne.s32.totalorder %s1356_s22, %s902_s17  ;;  %p907_p9 = scmp.lt.u32.totalorder %s1356_s22, %s1403_s3 }
 0x134   : > { %p908_p4 = scmp.lt.u32.totalorder %s906_s29, %s902_s17  ;;  %p910_p0 = scmp.lt.u32.totalorder %s902_s17, %s1356_s22 }
 0x135   : > { %p904_p7 = pnand %p903_p6, %p1419_p11 }
 0x136   : > { %p909_p8 = por %p908_p4, %p907_p9 }
 0x137   : > { %p905_p12 = pneg %p904_p7 }
 0x138   : > { %p911_p13 = por %p910_p0, %p909_p8 }
 0x13a   : > { %p912_p3 = pnand %p911_p13, %p905_p12 }
 0x13c   : > { %915 = shalt.err (!%p912_p3)
}
 0x13d   : > { %740 = dma.vmem_to_hbm [thread:$0]  (%p1419_p11), %s1358_s10, 32, %s1356_s22, %s585_s25  }
 0x13e PF: > { %s611_s5 = sand.u32 1, %s950_s12   ;;  %p1420_p5 = scmp.ne.s32.totalorder %s1408_s19, 0 }
 0x13f   : > { %p1421_p10 = scmp.ge.s32.totalorder %s962_s15, 2  ;;  %s612_s6 = scalar_lea.sflag [#allocation4], %s611_s5 }
 0x141   : > { %p754_p1 = pnand %p1421_p10, %p1420_p5 }
 0x143   : > { %945 = dma.done.wait (!%p754_p1), %s612_s6, 32  }
 0x144   : > { %947 = vsyncadd (!%p754_p1), %s612_s6, 4294967264  ;;  %p18_p2 = scmp.ge.s32.totalorder %s1055_s24, 4   ;;  %s1422_s12 = smov %s954_s13 }
 0x145   : > { %s1423_s13 = smov %s958_s14  ;;  %s1424_s14 = smov %s1111_s7 }
 0x146   : > { %s1425_s15 = smov %s1055_s24  ;;  %20 = sbr.rel (!%p18_p2) target bundleno = 7 (0x7), region = 95 }
 0x14d   :  { %617 = vsyncpa [#allocation3], 1 }
 0x14e   :  { %619 = vsyncpa [#allocation3 + $0x1], 1 }
 0x14f   :  { %620 = vsyncpa [#allocation8], 1 }
 0x150   :  { %622 = vsyncpa [#allocation8 + $0x1], 1 }
 0x151   :  { %623 = vsyncpa [#allocation4], 1 }
 0x152   :  { %625 = vsyncpa [#allocation4 + $0x1], 1 }
 0x153   :  { %626 = vsyncpa [#allocation5], 1 }
 0x154   :  { %628 = vsyncpa [#allocation5 + $0x1], 1 }

</bundles_post_ra>
